<compile_context>
chip_gen: v5e
topology: v5e:2x2
jax: 0.10.0
libtpu: 0.0.40
codegen_flags: <defaults>
</compile_context>

<pallas_src>
import jax
import jax.numpy as jnp
from jax.experimental import pallas as pl
from jax.experimental.pallas import tpu as pltpu


def _copy_kernel(x_ref, o_ref):
    # Pure streaming copy — forward() returns img unchanged.
    o_ref[...] = x_ref[...]


def _pallas_identity_copy(img):
    """Materialize a copy of `img` via a lane-dense, large-block streaming copy."""
    orig_shape = img.shape
    total = img.size

    # ---- lane-dense 2-D layout: last dim a large multiple of 128 ----
    cols = None
    for w in (1024, 512, 256, 128):
        if total % w == 0:
            cols = w
            break
    if cols is None:
        # Degenerate fallback: single row; block == full array dims, so the
        # (8,128) divisibility rule is satisfied by full-extent blocking.
        cols = total
    rows = total // cols
    flat = img.reshape(rows, cols)

    # ---- biggest block that fits a conservative VMEM budget ----
    # Default double-buffering costs 2 buffers x (in + out) per block, so a
    # 4 MiB block -> ~16 MiB VMEM, safely under the 32 MiB scoped default and
    # well within v7x's 64 MiB physical VMEM.
    per_block_budget_bytes = 4 * 1024 * 1024
    bytes_per_row = cols * flat.dtype.itemsize
    max_rows = max(1, per_block_budget_bytes // bytes_per_row)
    if max_rows >= rows:
        block_rows = rows                       # single block: zero grid overhead
    else:
        block_rows = max(8, (max_rows // 8) * 8)  # sublane (8) aligned

    grid = (pl.cdiv(rows, block_rows),)
    spec = pl.BlockSpec((block_rows, cols), lambda i: (i, 0))

    out = pl.pallas_call(
        _copy_kernel,
        out_shape=jax.ShapeDtypeStruct(flat.shape, flat.dtype),
        grid=grid,
        in_specs=[spec],
        out_specs=spec,
        compiler_params=pltpu.CompilerParams(
            dimension_semantics=("parallel",),   # shard grid across v7x's 2 TCs
            vmem_limit_bytes=32 * 1024 * 1024,
        ),
    )(flat)
    return out.reshape(orig_shape)


def example_model_forward(img, img_metas=None, test_mode=False,
                          materialize=False, **kwargs):
    """Pallas equivalent of ExampleModel.forward: identity on img (NCHW).

    The zero-cost default path returns `img` directly (exactly what the PyTorch
    forward does — no HBM read/write, no grid overhead). Pass materialize=True
    if a freshly materialized output buffer is contractually required; that
    path runs the optimized Pallas streaming-copy kernel.
    """
    if not materialize:
        return img
    return _pallas_identity_copy(img)


def init_example_model_params(key):
    """Deterministic parameter init matching ExampleModel.__init__ shapes.

    (These parameters are unused by forward(), mirroring the PyTorch module.)
    """
    k1, k2, k3, k4 = jax.random.split(key, 4)
    return {
        # nn.Conv2d(3, 3, 3): weight (out_c, in_c, kH, kW), bias (out_c,)
        "conv_weight": jax.random.normal(k1, (3, 3, 3, 3), jnp.float32) * 0.1,
        "conv_bias": jax.random.normal(k2, (3,), jnp.float32) * 0.1,
        # nn.Linear(2, 1): weight (out, in), bias (out,)
        "predictor_weight": jax.random.normal(k3, (1, 2), jnp.float32) * 0.1,
        "predictor_bias": jax.random.normal(k4, (1,), jnp.float32) * 0.1,
    }


def train_step(data_batch, optimizer=None):
    """Mirror of ExampleModel.train_step: loss = forward(**data_batch)."""
    loss = example_model_forward(**data_batch)
    return dict(loss=loss)


if __name__ == "__main__":
    key = jax.random.PRNGKey(0)
    k_param, k_img = jax.random.split(key)

    params = init_example_model_params(k_param)  # unused by forward, as in PyTorch

    # Small NCHW input consistent with the module (conv expects 3 channels).
    img = jax.random.normal(k_img, (2, 3, 16, 16), jnp.float32)
    metas = [{} for _ in range(2)]

    # Zero-cost hot path (matches PyTorch: the same tensor is returned).
    out_fast = example_model_forward(img, metas)
    assert out_fast is img

    # Run the optimized Pallas copy kernel once (materialized output path).
    out = example_model_forward(img, metas, materialize=True)
    out = jax.block_until_ready(out)

    assert out.shape == img.shape
    assert out.dtype == img.dtype
    assert jnp.allclose(out, img)

    result = train_step({"img": img, "img_metas": metas})
    jax.block_until_ready(result["loss"])

    print("KERNEL_OK")
</pallas_src>

<mosaic_0001>
module attributes {stable_mosaic.version = 11 : i64} {
  func.func @_copy_kernel(%arg0: i32, %arg1: memref<3x512xf32, #tpu.memory_space<vmem>>, %arg2: memref<3x512xf32, #tpu.memory_space<vmem>>) attributes {dimension_semantics = [#tpu.dimension_semantics<parallel>], iteration_bounds = array<i64: 1>, scalar_prefetch = 0 : i64, scratch_operands = 0 : i64, tpu.core_type = #tpu.core_type<tc>, window_params = [{transform_indices = @transform_0, window_bounds = array<i64: 3, 512>}, {transform_indices = @transform_1, window_bounds = array<i64: 3, 512>}]} {
    %c0 = arith.constant 0 : index
    %c0_0 = arith.constant 0 : index
    %0 = vector.load %arg1[%c0, %c0_0] : memref<3x512xf32, #tpu.memory_space<vmem>>, vector<3x512xf32>
    %c0_1 = arith.constant 0 : index
    %c0_2 = arith.constant 0 : index
    %1 = vector.load %arg2[%c0_1, %c0_2] : memref<3x512xf32, #tpu.memory_space<vmem>>, vector<3x512xf32>
    tpu.vector_store %arg2[%c0_1, %c0_2], %0 {strides = array<i32>} : memref<3x512xf32, #tpu.memory_space<vmem>>, vector<3x512xf32>,
    return
  }
  func.func @transform_0(%arg0: i32) -> (i32, i32) {
    %c0_i32 = arith.constant 0 : i32
    %c0_i32_0 = arith.constant 0 : i32
    return %arg0, %c0_i32 : i32, i32
  }
  func.func @transform_1(%arg0: i32) -> (i32, i32) {
    %c0_i32 = arith.constant 0 : i32
    %c0_i32_0 = arith.constant 0 : i32
    return %arg0, %c0_i32 : i32, i32
  }
}

</mosaic_0001>

<bundles_post_ra>
// kernel: tpu_custom_call.1
= control target key start
LH: loop header
LB: loop body
LE: loop exit
PB: predicated region body
PF: predicated region fallthrough
CT: control target
= control target key end

     0   :  { %6 = vsyncpa [#allocation3], 0  ;;  %s116_s0 = inlined_call_operand.hbm [shape: f32[3,512], index: 0, kind: input, shape index: {}]   ;;  %s117_s1 = inlined_call_operand.hbm [shape: f32[3,512], index: 1, kind: output, shape index: {}]  }
   0x1   :  { %7 = vsyncpa [#allocation4], 0  ;;  %s13_s8 = sshll.u32 %s116_s0, 4  ;;  %s98_s9 = smov [#allocation2]   ;;  %s14_s8 = int_to_ptr.hbm [resolvable:$true] %s13_s8 }
   0x2   :  { %s15_s10 = sshll.u32 %s98_s9, 4  ;;  %s16_s10 = int_to_ptr.vmem [resolvable:$true] %s15_s10 }
   0x3   :  { %18 = dma.hbm_to_vmem [thread:$0]  %s14_s8, 256, %s16_s10, [#allocation3]  }
   0x4   :  { %94 = dma.done.wait [#allocation3], 256  }
   0x5   :  { %95 = vsyncadd [#allocation3], 4294967040  ;;  %s99_s11 = smov [#allocation5]   ;;  %s34_s15 = sshll.u32 %s117_s1, 4  ;;  %v23_v0 = vld [vmem:[#allocation2] sm:$0x77]  ;;  %s35_s15 = int_to_ptr.hbm [resolvable:$true] %s34_s15 }
   0x6   :  { %s32_s12 = sshll.u32 %s99_s11, 4  ;;  %v24_v1 = vld [vmem:[#allocation2 + $0x8] sm:$0x77]  ;;  %25 = vst [vmem:[#allocation5] sm:$0x77] %v23_v0  ;;  %s33_s12 = int_to_ptr.vmem [resolvable:$true] %s32_s12 }
   0x7   :  { %26 = vst [vmem:[#allocation5 + $0x8] sm:$0x77] %v24_v1 }
   0x8   :  { %37 = dma.vmem_to_hbm [thread:$0]  %s33_s12, 256, %s35_s15, [#allocation4]  }
   0x9   :  { %96 = dma.done.wait [#allocation4], 256  }
   0xa   :  { %97 = vsyncadd [#allocation4], 4294967040 }
   0xb   :  { %42 = vsyncpa [#allocation3], 1 }
   0xc   :  { %43 = vsyncpa [#allocation4], 1 }

</bundles_post_ra>
